<compile_context>
chip_gen: v7x
topology: tpu7x:2x2x1
jax: 0.10.0
libtpu: 0.0.40
codegen_flags: <defaults>
</compile_context>

<pallas_src>
import functools

import jax
import jax.numpy as jnp
from jax.experimental import pallas as pl
from jax.experimental.pallas import tpu as pltpu


def _moving_avg_kernel(x_ref, o_ref, *, kernel_size, stride, pad, l_out):
    """x_ref: (L, tC) channel tile of one batch element; o_ref: (L_out, tC)."""
    x = x_ref[...]                                   # (L, tC)
    L, tC = x.shape

    # Edge-replication padding along time, built in VMEM (no extra HBM traffic).
    if pad > 0:
        front = jnp.broadcast_to(x[0:1, :], (pad, tC))
        end = jnp.broadcast_to(x[L - 1:L, :], (pad, tC))
        xp = jnp.concatenate([front, x, end], axis=0)  # (L + 2*pad, tC)
    else:
        xp = x

    # Unrolled k-tap windowed sum (kernel_size is a static Python int).
    span = (l_out - 1) * stride + 1
    acc = jnp.zeros((l_out, tC), jnp.float32)
    for j in range(kernel_size):
        acc = acc + xp[j:j + span:stride, :].astype(jnp.float32)

    o_ref[...] = (acc * (1.0 / kernel_size)).astype(o_ref.dtype)


def _pick_channel_tile(C: int) -> int:
    # Lane-dense tiles (multiples of 128) when possible; otherwise take the
    # full channel dim (legal because block dim == full array dim).
    if C % 128 != 0:
        return C
    for t in (512, 384, 256, 128):
        if C % t == 0:
            return t
    return C


def pallas_moving_avg(x: jax.Array, kernel_size: int, stride: int = 1) -> jax.Array:
    """Equivalent of the PyTorch moving_avg forward for x of shape (B, L, C)."""
    B, L, C = x.shape
    pad = (kernel_size - 1) // 2
    L_pad = L + 2 * pad
    L_out = (L_pad - kernel_size) // stride + 1

    tC = _pick_channel_tile(C)
    grid = (B, C // tC)

    kern = functools.partial(
        _moving_avg_kernel,
        kernel_size=kernel_size, stride=stride, pad=pad, l_out=L_out)

    return pl.pallas_call(
        kern,
        out_shape=jax.ShapeDtypeStruct((B, L_out, C), x.dtype),
        grid_spec=pltpu.PrefetchScalarGridSpec(
            num_scalar_prefetch=0,
            grid=grid,
            in_specs=[
                pl.BlockSpec((pl.Squeezed(), L, tC), lambda b, c: (b, 0, c)),
            ],
            out_specs=pl.BlockSpec((pl.Squeezed(), L_out, tC),
                                   lambda b, c: (b, 0, c)),
        ),
        compiler_params=pltpu.CompilerParams(
            dimension_semantics=("parallel", "parallel"),
        ),
    )(x)


def moving_avg_ref(x: jax.Array, kernel_size: int, stride: int) -> jax.Array:
    """Pure-JAX reference mirroring the PyTorch module."""
    pad = (kernel_size - 1) // 2
    xp = jnp.concatenate(
        [jnp.repeat(x[:, :1, :], pad, axis=1),
         x,
         jnp.repeat(x[:, -1:, :], pad, axis=1)], axis=1)
    s = jax.lax.reduce_window(
        xp.astype(jnp.float32), 0.0, jax.lax.add,
        window_dimensions=(1, kernel_size, 1),
        window_strides=(1, stride, 1),
        padding="VALID")
    return (s / kernel_size).astype(x.dtype)


if __name__ == "__main__":
    # Small shapes consistent with the module's use on (batch, seq, channels).
    B, L, C = 2, 16, 32
    kernel_size, stride = 5, 1

    key = jax.random.PRNGKey(0)
    x = jax.random.normal(key, (B, L, C), dtype=jnp.float32)

    out = pallas_moving_avg(x, kernel_size, stride)
    out = jax.block_until_ready(out)

    ref = moving_avg_ref(x, kernel_size, stride)
    assert out.shape == ref.shape, (out.shape, ref.shape)
    assert out.dtype == x.dtype
    assert jnp.allclose(out, ref, atol=1e-5, rtol=1e-5), "mismatch vs reference"

    print("KERNEL_OK")
</pallas_src>

<mosaic_0001>
module attributes {stable_mosaic.version = 11 : i64} {
  func.func @_moving_avg_kernel(%arg0: i32, %arg1: i32, %arg2: memref<1x16x32xf32, #tpu.memory_space<vmem>>, %arg3: memref<1x16x32xf32, #tpu.memory_space<vmem>>) attributes {dimension_semantics = [#tpu.dimension_semantics<parallel>, #tpu.dimension_semantics<parallel>], iteration_bounds = array<i64: 2, 1>, scalar_prefetch = 0 : i64, scratch_operands = 0 : i64, tpu.core_type = #tpu.core_type<tc>, window_params = [{transform_indices = @transform_0, window_bounds = array<i64: 1, 16, 32>}, {transform_indices = @transform_1, window_bounds = array<i64: 1, 16, 32>}]} {
    %c0 = arith.constant 0 : index
    %c0_0 = arith.constant 0 : index
    %c0_1 = arith.constant 0 : index
    %0 = vector.load %arg2[%c0, %c0_0, %c0_1] : memref<1x16x32xf32, #tpu.memory_space<vmem>>, vector<1x16x32xf32>
    %1 = vector.shape_cast %0 : vector<1x16x32xf32> to vector<16x32xf32>
    %2 = vector.extract_strided_slice %1 {offsets = [0, 0], sizes = [1, 32], strides = [1, 1]} : vector<16x32xf32> to vector<1x32xf32>
    %3 = vector.shape_cast %2 : vector<1x32xf32> to vector<1x32xf32>
    %4 = vector.broadcast %3 : vector<1x32xf32> to vector<2x32xf32>
    %5 = vector.extract_strided_slice %1 {offsets = [15, 0], sizes = [1, 32], strides = [1, 1]} : vector<16x32xf32> to vector<1x32xf32>
    %6 = vector.shape_cast %5 : vector<1x32xf32> to vector<1x32xf32>
    %7 = vector.broadcast %6 : vector<1x32xf32> to vector<2x32xf32>
    %8 = tpu.concatenate %4, %1, %7 in 0 : vector<2x32xf32>, vector<16x32xf32>, vector<2x32xf32> -> vector<20x32xf32>
    %cst = arith.constant 0.000000e+00 : f32
    %9 = vector.broadcast %cst : f32 to vector<16x32xf32>
    %10 = vector.extract_strided_slice %8 {offsets = [0, 0], sizes = [16, 32], strides = [1, 1]} : vector<20x32xf32> to vector<16x32xf32>
    %11 = arith.addf %9, %10 : vector<16x32xf32>
    %12 = vector.extract_strided_slice %8 {offsets = [1, 0], sizes = [16, 32], strides = [1, 1]} : vector<20x32xf32> to vector<16x32xf32>
    %13 = arith.addf %11, %12 : vector<16x32xf32>
    %14 = vector.extract_strided_slice %8 {offsets = [2, 0], sizes = [16, 32], strides = [1, 1]} : vector<20x32xf32> to vector<16x32xf32>
    %15 = arith.addf %13, %14 : vector<16x32xf32>
    %16 = vector.extract_strided_slice %8 {offsets = [3, 0], sizes = [16, 32], strides = [1, 1]} : vector<20x32xf32> to vector<16x32xf32>
    %17 = arith.addf %15, %16 : vector<16x32xf32>
    %18 = vector.extract_strided_slice %8 {offsets = [4, 0], sizes = [16, 32], strides = [1, 1]} : vector<20x32xf32> to vector<16x32xf32>
    %19 = arith.addf %17, %18 : vector<16x32xf32>
    %cst_2 = arith.constant 2.000000e-01 : f32
    %20 = vector.broadcast %cst_2 : f32 to vector<16x32xf32>
    %21 = arith.mulf %19, %20 : vector<16x32xf32>
    %c0_3 = arith.constant 0 : index
    %c0_4 = arith.constant 0 : index
    %c0_5 = arith.constant 0 : index
    %22 = vector.load %arg3[%c0_3, %c0_4, %c0_5] : memref<1x16x32xf32, #tpu.memory_space<vmem>>, vector<1x16x32xf32>
    %23 = vector.shape_cast %22 : vector<1x16x32xf32> to vector<16x32xf32>
    %24 = vector.shape_cast %21 : vector<16x32xf32> to vector<1x16x32xf32>
    tpu.vector_store %arg3[%c0_3, %c0_4, %c0_5], %24 {strides = array<i32>} : memref<1x16x32xf32, #tpu.memory_space<vmem>>, vector<1x16x32xf32>,
    return
  }
  func.func @transform_0(%arg0: i32, %arg1: i32) -> (i32, i32, i32) {
    %c0_i32 = arith.constant 0 : i32
    %c0_i32_0 = arith.constant 0 : i32
    return %arg0, %c0_i32, %arg1 : i32, i32, i32
  }
  func.func @transform_1(%arg0: i32, %arg1: i32) -> (i32, i32, i32) {
    %c0_i32 = arith.constant 0 : i32
    %c0_i32_0 = arith.constant 0 : i32
    return %arg0, %c0_i32, %arg1 : i32, i32, i32
  }
}

</mosaic_0001>

<bundles_post_ra>
// kernel: tpu_custom_call.1
= control target key start
LH: loop header
LB: loop body
LE: loop exit
PB: predicated region body
PF: predicated region fallthrough
CT: control target
= control target key end

     0   :  { %6 = vsyncpa [#allocation3], 0  ;;  %s720_s0 = inlined_call_operand.hbm [shape: f32[2,16,32], index: 0, kind: input, shape index: {}]   ;;  %s721_s1 = inlined_call_operand.hbm [shape: f32[2,16,32], index: 1, kind: output, shape index: {}]  }
   0x1   :  { %8 = vsyncpa [#allocation3 + $0x1], 0 }
   0x2   :  { %9 = vsyncpa [#allocation4], 0 }
   0x3   :  { %11 = vsyncpa [#allocation4 + $0x1], 0  ;;  %s535_s6 = smov 0   ;;  %s537_s7 = smov 0  }
   0x4   :  { %s539_s8 = smov 0   ;;  %s541_s9 = smov 0  }
   0x5   :  { %s543_s10 = smov 0   ;;  %s545_s11 = smov 0  }
   0x6 LB: > { %s322_s12 = sadd.s32 4294967295, %s517_s11   ;;  %s323_s13 = sadd.s32 4294967294, %s517_s11   ;;  %s517_s11 = sphi %s545_s11, %s17_s11   ;;  %s513_s10 = sphi %s543_s10, %s736_s10   ;;  %s509_s9 = sphi %s541_s9, %s735_s9   ;;  %s505_s8 = sphi %s539_s8, %s734_s8   ;;  %s501_s7 = sphi %s537_s7, %s733_s7   ;;  %s497_s6 = sphi %s535_s6, %s732_s6  }
   0x7   : > { %s29_s14 = sadd.s32 1, %s513_s10  ;;  %s38_s15 = sadd.s32 1, %s505_s8 }
   0x8   : > { %p31_p0 = scmp.ge.s32.totalorder %s29_s14, 2  ;;  %p45_p1 = scmp.ne.s32.totalorder %s505_s8, %s501_s7 }
   0x9   : > { %p46_p2 = scmp.eq.s32.totalorder %s517_s11, 0  ;;  %p51_p3 = scmp.ne.s32.totalorder %s501_s7, %s497_s6 }
   0xa   : > { %s738_s14 = smov (%p31_p0, %s29_s14), 0  ;;  %p52_p5 = scmp.eq.s32.totalorder %s322_s12, 0 }
   0xb   : > { %p576_p4 = por %p46_p2, %p45_p1  ;;  %s33_s17 = ssub.s32 %s513_s10, %s738_s14 }
   0xc   : > { %p77_p6 = scmp.eq.s32.totalorder %s322_s12, 1  ;;  %p36_p7 = scmp.eq.s32.totalorder %s33_s17, 0 }
   0xd   : > { %p582_p8 = por %p52_p5, %p51_p3  ;;  %p83_p10 = scmp.eq.s32.totalorder %s323_s13, 1 }
   0xe   : > { %p586_p9 = por %p77_p6, %p45_p1  ;;  %p351_p13 = scmp.lt.s32.totalorder %s517_s11, 2 }
   0xf   : > { %s591_s20 = scalar_select %p36_p7, %s505_s8, %s38_s15  }
  0x10   : > { %s725_s19 = scalar_select %p586_p9, 1, 0 }
  0x11   : > { %p593_p11 = por %p83_p10, %p51_p3  ;;  %s103_s22 = sand.u32 1, %s505_s8  }
  0x12   : > { %s326_s23 = sshll.u32 %s103_s22, 4  ;;  %s337_s24 = sshll.u32 %s513_s10, 8 }
  0x13   : > { %s726_s21 = scalar_select %p593_p11, 1, 0 }
  0x14   : > { %s604_s27 = scalar_lea.hbm %s720_s0, %s337_s24  ;;  %s107_s28 = scalar_lea.vmem [#allocation2], %s326_s23 }
  0x15   : > { %s115_s29 = sshll.u32 %s107_s28, 4  ;;  %p610_p0 = pnand %p351_p13, %p576_p4  ;;  %s606_s29 = int_to_ptr.vmem [resolvable:$true] %s115_s29 }
  0x16   : > { %s615_s2 = scalar_lea.sflag [#allocation3], %s103_s22  ;;  %s405_s3 = scalar_lea.hbm %s604_s27, 256 }
  0x17   : > { %p406_p2 = scmp.ne.s32.totalorder %s604_s27, %s405_s3  ;;  %p407_p3 = pneg %p610_p0 }
  0x18   : > { %s410_s12 = scalar_lea.hbm %s720_s0, 512  ;;  %p411_p4 = scmp.lt.u32.totalorder %s604_s27, %s720_s0 }
  0x19   : > { %p408_p5 = pnand %p407_p3, %p406_p2  ;;  %p412_p7 = scmp.lt.u32.totalorder %s410_s12, %s405_s3 }
  0x1a   : > { %p414_p13 = scmp.lt.u32.totalorder %s405_s3, %s604_s27 }
  0x1b   : > { %p409_p6 = pneg %p408_p5  ;;  %p413_p10 = por %p412_p7, %p411_p4 }
  0x1d   : > { %p415_p12 = por %p414_p13, %p413_p10 }
  0x1f   : > { %p416_p1 = pnand %p415_p12, %p409_p6 }
  0x21   : > { %419 = shalt.err (!%p416_p1)
}
  0x22   : > { %s420_s16 = scalar_lea.vmem %s606_s29, 256  ;;  %s519_s17 = smov [#allocation2]  }
  0x23   : > { %p421_p2 = scmp.ne.s32.totalorder %s606_s29, %s420_s16  ;;  %s425_s22 = sshll.u32 %s519_s17, 4  ;;  %s426_s22 = int_to_ptr.vmem [resolvable:$false] %s425_s22 }
  0x24   : > { %s427_s23 = scalar_lea.vmem %s426_s22, 512  ;;  %p428_p9 = scmp.lt.s32.totalorder %s606_s29, %s426_s22 }
  0x25   : > { %p423_p5 = pnand %p421_p2, %p407_p3  ;;  %p429_p4 = scmp.lt.s32.totalorder %s427_s23, %s420_s16 }
  0x27   : > { %p424_p11 = pneg %p423_p5  ;;  %p430_p7 = por %p429_p4, %p428_p9 }
  0x29   : > { %p431_p10 = pnand %p430_p7, %p424_p11 }
  0x2b   : > { %434 = shalt.err (!%p431_p10)
}
  0x2c   : > { %s520_s24 = smov 128   ;;  %s521_s25 = smov 8  }
  0x2d   : > { %346 = dma.hbm_to_vmem [thread:$0]  (!%p610_p0), %s604_s27, 256, %s606_s29, %s615_s2, %s520_s24, %s520_s24, %s521_s25  }
  0x2e   : > { %p123_p12 = scmp.lt.s32.totalorder %s517_s11, 3  ;;  %p728_p1 = scmp.ge.s32.totalorder %s517_s11, 1 }
  0x30   : > { %p124_p3 = pnand %p728_p1, %p123_p12 }
  0x31   : > { %s647_s26 = sand.u32 (!%p124_p3), 1, %s501_s7  }
  0x32   : > { %127 = sbr.rel (%p124_p3) target bundleno = 96 (0x60), region = 24  ;;  %s330_s28 = sshll.u32 (!%p124_p3), %s647_s26, 4 }
  0x33   : > { %s130_s3 = scalar_lea.sflag (!%p124_p3), [#allocation3], %s647_s26  ;;  %s133_s4 = scalar_lea.vmem (!%p124_p3), [#allocation2], %s330_s28 }
  0x39   : > { %488 = dma.done.wait (%p582_p8), %s130_s3, 256  }
  0x3a   : > { %490 = vsyncadd (%p582_p8), %s130_s3, 4294967040  ;;  %v154_v0 = vlaneseq  ;;  %v152_v4 = vld [vmem:[%s133_s4] sm:$0xff]  ;;  %v153_v5 = vld [vmem:[%s133_s4 + $0x8] sm:$0xff]  ;;  %vm164_vm0 = vcmask 1041408   ;;  %vm177_vm1 = vcmask 1046528   ;;  %vm187_vm2 = vcmask 1045504  }
  0x3b   : > { %v165_v7 = vrot.slane %v152_v4, 6  ;;  %v166_v8 = vrot.slane %v153_v5, 6  ;;  %vm197_vm3 = vcmask 1044480   ;;  %vm207_vm4 = vcmask 1043456   ;;  %s151_s18 = scalar_lea.vmem [#allocation5], %s330_s28  ;;  %s338_s29 = sshll.u32 %s509_s9, 8 }
  0x3c   : > { %v155_v1 = vshrl.u32 %v154_v0, 7  ;;  %s237_s27 = sshll.u32 %s151_s18, 4  ;;  %vm219_vm5 = vcmask 261120   ;;  %s671_s5 = scalar_lea.hbm %s721_s1, %s338_s29  ;;  %s666_s27 = int_to_ptr.vmem [resolvable:$true] %s237_s27 }
  0x3d   : > { %v167_v10 = vsel %vm164_vm0, %v165_v7, %v166_v8  ;;  %s223_s12 = scalar_lea.sflag [#allocation4], %s647_s26  ;;  %s435_s13 = scalar_lea.vmem %s666_s27, 256 }
  0x3e   : > { %v156_v2 = vsub.s32 0, %v155_v1  ;;  %v160_v3 = vsub.s32 7, %v155_v1  ;;  %v179_v14 = vrot.slane %v167_v10, 1  ;;  %v189_v16 = vrot.slane %v167_v10, 2  ;;  %p436_p8 = scmp.ne.s32.totalorder %s666_s27, %s435_s13  ;;  %p729_p9 = scmp.ne.s32.totalorder %s725_s19, 0 }
  0x3f   : > { %v199_v18 = vrot.slane %v167_v10, 3  ;;  %v209_v20 = vrot.slane %v167_v10, 4  ;;  %s522_s9 = smov [#allocation5]  }
  0x40   : > { %v157_v6 = vrot.slane %v152_v4, %v156_v2  ;;  %v161_v9 = vrot.slane %v153_v5, %v160_v3  ;;  %p437_p11 = pnand %p436_p8, %p729_p9  ;;  %s439_s15 = sshll.u32 %s522_s9, 4  ;;  %s440_s15 = int_to_ptr.vmem [resolvable:$false] %s439_s15 }
  0x41   : > { %s441_s16 = scalar_lea.vmem %s440_s15, 512  ;;  %p442_p6 = scmp.lt.s32.totalorder %s666_s27, %s440_s15 }
  0x42   : > { %v171_v11 = vsel %vm164_vm0, %v157_v6, %v165_v7  ;;  %v172_v12 = vsel %vm164_vm0, %v166_v8, %v161_v9  ;;  %p438_p0 = pneg %p437_p11  ;;  %p443_p13 = scmp.lt.s32.totalorder %s441_s16, %s435_s13 }
  0x43   : > { %v178_v13 = vrot.slane %v171_v11, 1  ;;  %v188_v15 = vrot.slane %v171_v11, 2  ;;  %v198_v17 = vrot.slane %v171_v11, 3  ;;  %v208_v19 = vrot.slane %v171_v11, 4 }
  0x44   : > { %v181_v23 = vrot.slane %v172_v12, 1  ;;  %v191_v24 = vrot.slane %v172_v12, 2  ;;  %v201_v26 = vrot.slane %v172_v12, 3  ;;  %v211_v30 = vrot.slane %v172_v12, 4  ;;  %p444_p2 = por %p443_p13, %p442_p6 }
  0x45   : > { %v180_v21 = vsel %vm177_vm1, %v178_v13, %v179_v14  ;;  %v190_v22 = vsel %vm187_vm2, %v188_v15, %v189_v16  ;;  %v200_v27 = vsel %vm197_vm3, %v198_v17, %v199_v18  ;;  %v210_v33 = vsel %vm207_vm4, %v208_v19, %v209_v20 }
  0x46   : > { %v185_v25 = vadd.f32 %v180_v21, %v171_v11  ;;  %v182_v28 = vsel %vm177_vm1, %v179_v14, %v181_v23  ;;  %v192_v29 = vsel %vm187_vm2, %v189_v16, %v191_v24  ;;  %v202_v34 = vsel %vm197_vm3, %v199_v18, %v201_v26  ;;  %p445_p5 = pnand %p444_p2, %p438_p0 }
  0x47   : > { %v186_v32 = vadd.f32 %v182_v28, %v167_v10  ;;  %v212_v37 = vsel %vm207_vm4, %v209_v20, %v211_v30 }
  0x48   : > { %v195_v31 = vadd.f32 %v190_v22, %v185_v25 }
  0x49   : > { %v196_v36 = vadd.f32 %v192_v29, %v186_v32 }
  0x4a   : > { %v205_v35 = vadd.f32 %v200_v27, %v195_v31 }
  0x4b   : > { %v206_v39 = vadd.f32 %v202_v34, %v196_v36 }
  0x4c   : > { %v215_v38 = vadd.f32 %v210_v33, %v205_v35 }
  0x4d   : > { %v216_v41 = vadd.f32 %v212_v37, %v206_v39 }
  0x4e   : > { %v217_v40 = vmul.f32 0.2, %v215_v38 }
  0x4f   : > { %v218_v42 = vmul.f32 0.2, %v216_v41 }
  0x50   : > { %220 = vst.msk [vmem:[%s151_s18] sm:$0xff] %vm219_vm5, %v217_v40 }
  0x51   : > { %221 = vst.msk [vmem:[%s151_s18 + $0x8] sm:$0xff] %vm219_vm5, %v218_v42 }
  0x52   : > { %448 = shalt.err (!%p445_p5)
}
  0x53   : > { %s449_s17 = scalar_lea.hbm %s671_s5, 256  ;;  %s453_s24 = scalar_lea.hbm %s721_s1, 512 }
  0x54   : > { %p450_p4 = scmp.ne.s32.totalorder %s671_s5, %s449_s17  ;;  %p454_p12 = scmp.lt.u32.totalorder %s671_s5, %s721_s1 }
  0x55   : > { %p455_p1 = scmp.lt.u32.totalorder %s453_s24, %s449_s17  ;;  %p457_p8 = scmp.lt.u32.totalorder %s449_s17, %s671_s5 }
  0x56   : > { %p451_p7 = pnand %p450_p4, %p729_p9 }
  0x57   : > { %p456_p3 = por %p455_p1, %p454_p12 }
  0x58   : > { %p452_p10 = pneg %p451_p7 }
  0x59   : > { %p458_p11 = por %p457_p8, %p456_p3 }
  0x5b   : > { %p459_p0 = pnand %p458_p11, %p452_p10 }
  0x5d   : > { %462 = shalt.err (!%p459_p0)
}
  0x5e   : > { %s523_s3 = smov 128   ;;  %s524_s4 = smov 8  }
  0x5f   : > { %341 = dma.vmem_to_hbm [thread:$0]  (%p729_p9), %s666_s27, 256, %s671_s5, %s223_s12, %s523_s3, %s523_s3, %s524_s4  }
  0x60 PF: > { %s252_s18 = sand.u32 1, %s497_s6   ;;  %p730_p6 = scmp.ne.s32.totalorder %s726_s21, 0 }
  0x61   : > { %p731_p13 = scmp.ge.s32.totalorder %s517_s11, 2  ;;  %s253_s29 = scalar_lea.sflag [#allocation4], %s252_s18 }
  0x63   : > { %p348_p2 = pnand %p731_p13, %p730_p6 }
  0x65   : > { %492 = dma.done.wait (!%p348_p2), %s253_s29, 256  }
  0x66   : > { %494 = vsyncadd (!%p348_p2), %s253_s29, 4294967040  ;;  %s17_s11 = sadd.s32 1, %s517_s11   ;;  %s732_s6 = smov %s501_s7 }
  0x67   : > { %p14_p5 = scmp.ge.s32.totalorder %s17_s11, 4   ;;  %s733_s7 = smov %s505_s8 }
  0x68   : > { %s734_s8 = smov %s591_s20  ;;  %s735_s9 = smov %s513_s10 }
  0x69   : > { %s736_s10 = smov %s738_s14  ;;  %16 = sbr.rel (!%p14_p5) target bundleno = 6 (0x6), region = 69 }
  0x70   :  { %258 = vsyncpa [#allocation3], 1 }
  0x71   :  { %260 = vsyncpa [#allocation3 + $0x1], 1 }
  0x72   :  { %261 = vsyncpa [#allocation4], 1 }
  0x73   :  { %263 = vsyncpa [#allocation4 + $0x1], 1 }

</bundles_post_ra>
